<compile_context>
chip_gen: v5e
topology: v5e:2x2
jax: 0.10.0
libtpu: 0.0.40
codegen_flags: <defaults>
</compile_context>

<pallas_src>
import functools

import jax
import jax.numpy as jnp
from jax import lax
from jax.experimental import pallas as pl
from jax.experimental.pallas import tpu as pltpu


# ------------------------------ Pallas kernel ------------------------------- #

def _mha_kernel(w_ref, b_ref, q_ref, k_ref, v_ref, o_ref, *, num_channels, spatial):
    """One sample: fused 1x1-conv projections + (no-softmax) attention + residual.

    w_ref: (3, C*S, C*S) f32 VMEM -- kron(W_{q,k,v}, I_S)  (q / k / v projections).
    b_ref: (3, C*S, 1)   f32 VMEM -- per-output-channel biases repeated S times.
    q_ref, k_ref, v_ref: (C*S, S) f32 VMEM -- row c*S + h holds sample[c, h, :].
    o_ref: (C*S, S) f32 VMEM -- row c*S + w holds result[c, w, :]  (i.e. (C, W, H) stacked).
    """
    C, S = num_channels, spatial
    f32 = jnp.float32

    qs = q_ref[...]                                   # (C*S, S)
    ks = k_ref[...]
    vs = v_ref[...]

    # 1x1 conv (pure channel mixing) as ONE MXU matmul per projection; bias broadcasts
    # along lanes from a (C*S, 1) column.
    cq = jnp.dot(w_ref[0], qs, preferred_element_type=f32) + b_ref[0]
    ck = jnp.dot(w_ref[1], ks, preferred_element_type=f32) + b_ref[1]
    cv = jnp.dot(w_ref[2], vs, preferred_element_type=f32) + b_ref[2]

    # Per-channel attention with the permute(0, 2, 1) transposes folded into
    # dot_general dimension_numbers (no explicit .T / vxpose).
    outs = []
    for c in range(C):
        lo = c * S                                     # 8-aligned sublane offset
        cq_c = cq[lo:lo + S, :]                        # (S, S)
        ck_c = ck[lo:lo + S, :]
        cv_c = cv[lo:lo + S, :]
        # attn = cq_c^T @ ck_c  : contract dim 0 of both (TN)        -> (W, W)
        attn = lax.dot_general(cq_c, ck_c, (((0,), (0,)), ((), ())),
                               preferred_element_type=f32)
        # out  = attn @ cv_c^T  : contract dim 1 of both (NT)        -> (W, H)
        outs.append(lax.dot_general(attn, cv_c, (((1,), (1,)), ((), ())),
                                    preferred_element_type=f32))

    # Residual: reference adds the (C, W, H) attention output to the (C, H, W) input
    # element-wise (H == W), so the stacked slabs add directly.  Single full-block store.
    o_ref[...] = jnp.concatenate(outs, axis=0) + qs


# ------------------------------ wrappers ------------------------------------ #

def pack_params(params, spatial):
    """Hoisted out of the jitted forward (run once): kron-pack weights, repeat biases."""
    wq, bq, wk, bk, wv, bv = params
    eye = jnp.eye(spatial, dtype=jnp.float32)
    w_kron = jnp.stack(
        [jnp.kron(w.astype(jnp.float32), eye) for w in (wq, wk, wv)])      # (3, C*S, C*S)
    b_rep = jnp.stack(
        [jnp.repeat(b.astype(jnp.float32), spatial)[:, None]
         for b in (bq, bk, bv)])                                           # (3, C*S, 1)
    return w_kron, b_rep


@jax.jit
def multi_head_attention(q, k, v, w_kron, b_rep):
    """Batched forward of MultiHeadAttention(size=C) on (N, C, H, W) inputs, H == W."""
    N, C, H, W = q.shape
    assert H == W, "residual add in the reference module requires H == W"
    CS = C * H

    # Free, contiguous reshapes to the channel-stacked slab layout.
    qs = q.reshape(N, CS, W).astype(jnp.float32)
    ks = k.reshape(N, CS, W).astype(jnp.float32)
    vs = v.reshape(N, CS, W).astype(jnp.float32)

    kernel = functools.partial(_mha_kernel, num_channels=C, spatial=H)
    sample_spec = pl.BlockSpec((None, CS, W), lambda n: (n, 0, 0))

    out = pl.pallas_call(
        kernel,
        out_shape=jax.ShapeDtypeStruct((N, CS, H), jnp.float32),
        grid=(N,),
        in_specs=[
            pl.BlockSpec((3, CS, CS), lambda n: (0, 0, 0)),   # kron-packed weights (VMEM)
            pl.BlockSpec((3, CS, 1), lambda n: (0, 0, 0)),    # repeated biases    (VMEM)
            sample_spec,                                       # q
            sample_spec,                                       # k
            sample_spec,                                       # v
        ],
        out_specs=sample_spec,
        compiler_params=pltpu.CompilerParams(
            dimension_semantics=("parallel",)),                # batch shards across TCs (v7x)
    )(w_kron, b_rep, qs, ks, vs)

    # Slab row c*W + w is result[c, w, :]; free reshape back to (N, C, W, H).
    return out.reshape(N, C, W, H)


# --------------------------------- main -------------------------------------- #

if __name__ == "__main__":
    N, C, H, W = 2, 4, 16, 16   # batch of 2 independent samples of the unbatched module

    key = jax.random.PRNGKey(0)
    keys = jax.random.split(key, 9)
    q = jax.random.normal(keys[0], (N, C, H, W), dtype=jnp.float32)
    k = jax.random.normal(keys[1], (N, C, H, W), dtype=jnp.float32)
    v = jax.random.normal(keys[2], (N, C, H, W), dtype=jnp.float32)

    # Deterministic Conv2d(size, size, 1) parameters (kernel squeezed to (C, C)).
    scale = 1.0 / jnp.sqrt(jnp.float32(C))
    wq = jax.random.uniform(keys[3], (C, C), jnp.float32, -scale, scale)
    bq = jax.random.uniform(keys[4], (C,), jnp.float32, -scale, scale)
    wk = jax.random.uniform(keys[5], (C, C), jnp.float32, -scale, scale)
    bk = jax.random.uniform(keys[6], (C,), jnp.float32, -scale, scale)
    wv = jax.random.uniform(keys[7], (C, C), jnp.float32, -scale, scale)
    bv = jax.random.uniform(keys[8], (C,), jnp.float32, -scale, scale)
    params = (wq, bq, wk, bk, wv, bv)

    w_kron, b_rep = pack_params(params, spatial=H)      # once, outside the jitted forward

    out = multi_head_attention(q, k, v, w_kron, b_rep)
    out = jax.block_until_ready(out)

    # Pure-JAX reference of the unbatched PyTorch module, applied per sample.
    def reference_forward(qi, ki, vi):
        def conv(x, w, b):
            return jnp.einsum("oc,chw->ohw", w, x) + b[:, None, None]
        q_p = jnp.transpose(conv(qi, wq, bq), (0, 2, 1))
        k_p = jnp.transpose(conv(ki, wk, bk), (0, 2, 1))
        v_p = jnp.transpose(conv(vi, wv, bv), (0, 2, 1))
        attn = jnp.matmul(q_p, jnp.swapaxes(k_p, -2, -1))
        return jnp.matmul(attn, v_p) + qi

    ref = jnp.stack([reference_forward(q[i], k[i], v[i]) for i in range(N)])
    assert out.shape == (N, C, W, H)
    err = jnp.max(jnp.abs(out - ref))
    assert jnp.allclose(out, ref, atol=1e-4, rtol=1e-4), f"mismatch vs reference: {err}"

    print("KERNEL_OK")
</pallas_src>

<mosaic_0001>
module attributes {stable_mosaic.version = 11 : i64} {
  func.func @_mha_kernel(%arg0: i32, %arg1: memref<3x64x64xf32, #tpu.memory_space<vmem>>, %arg2: memref<3x64x1xf32, #tpu.memory_space<vmem>>, %arg3: memref<1x64x16xf32, #tpu.memory_space<vmem>>, %arg4: memref<1x64x16xf32, #tpu.memory_space<vmem>>, %arg5: memref<1x64x16xf32, #tpu.memory_space<vmem>>, %arg6: memref<1x64x16xf32, #tpu.memory_space<vmem>>) attributes {dimension_semantics = [#tpu.dimension_semantics<parallel>], iteration_bounds = array<i64: 2>, scalar_prefetch = 0 : i64, scratch_operands = 0 : i64, tpu.core_type = #tpu.core_type<tc>, window_params = [{pipeline_mode = #tpu.pipeline_mode<synchronous>, transform_indices = @transform_0, window_bounds = array<i64: 3, 64, 64>}, {pipeline_mode = #tpu.pipeline_mode<synchronous>, transform_indices = @transform_1, window_bounds = array<i64: 3, 64, 1>}, {transform_indices = @transform_2, window_bounds = array<i64: 1, 64, 16>}, {transform_indices = @transform_3, window_bounds = array<i64: 1, 64, 16>}, {transform_indices = @transform_4, window_bounds = array<i64: 1, 64, 16>}, {transform_indices = @transform_5, window_bounds = array<i64: 1, 64, 16>}]} {
    %c0 = arith.constant 0 : index
    %c0_0 = arith.constant 0 : index
    %c0_1 = arith.constant 0 : index
    %0 = vector.load %arg3[%c0, %c0_0, %c0_1] : memref<1x64x16xf32, #tpu.memory_space<vmem>>, vector<1x64x16xf32>
    %1 = vector.shape_cast %0 : vector<1x64x16xf32> to vector<64x16xf32>
    %c0_2 = arith.constant 0 : index
    %c0_3 = arith.constant 0 : index
    %c0_4 = arith.constant 0 : index
    %2 = vector.load %arg4[%c0_2, %c0_3, %c0_4] : memref<1x64x16xf32, #tpu.memory_space<vmem>>, vector<1x64x16xf32>
    %3 = vector.shape_cast %2 : vector<1x64x16xf32> to vector<64x16xf32>
    %c0_5 = arith.constant 0 : index
    %c0_6 = arith.constant 0 : index
    %c0_7 = arith.constant 0 : index
    %4 = vector.load %arg5[%c0_5, %c0_6, %c0_7] : memref<1x64x16xf32, #tpu.memory_space<vmem>>, vector<1x64x16xf32>
    %5 = vector.shape_cast %4 : vector<1x64x16xf32> to vector<64x16xf32>
    %c0_8 = arith.constant 0 : index
    %c0_9 = arith.constant 0 : index
    %c0_10 = arith.constant 0 : index
    %6 = vector.load %arg1[%c0_8, %c0_9, %c0_10] : memref<3x64x64xf32, #tpu.memory_space<vmem>>, vector<1x64x64xf32>
    %7 = vector.shape_cast %6 : vector<1x64x64xf32> to vector<64x64xf32>
    %cst = arith.constant dense<0.000000e+00> : vector<64x16xf32>
    %8 = tpu.matmul %7, %1, %cst {dimension_numbers = #tpu.dot_dimension_numbers<[1], [0], [0], [1], [0, 0, 1, 1], [], []>} : vector<64x64xf32>, vector<64x16xf32>, vector<64x16xf32> -> vector<64x16xf32>
    %c0_11 = arith.constant 0 : index
    %c0_12 = arith.constant 0 : index
    %c0_13 = arith.constant 0 : index
    %9 = vector.load %arg2[%c0_11, %c0_12, %c0_13] : memref<3x64x1xf32, #tpu.memory_space<vmem>>, vector<1x64x1xf32>
    %10 = vector.shape_cast %9 : vector<1x64x1xf32> to vector<64x1xf32>
    %11 = vector.broadcast %10 : vector<64x1xf32> to vector<64x16xf32>
    %12 = arith.addf %8, %11 : vector<64x16xf32>
    %c1 = arith.constant 1 : index
    %c0_14 = arith.constant 0 : index
    %c0_15 = arith.constant 0 : index
    %13 = vector.load %arg1[%c1, %c0_14, %c0_15] : memref<3x64x64xf32, #tpu.memory_space<vmem>>, vector<1x64x64xf32>
    %14 = vector.shape_cast %13 : vector<1x64x64xf32> to vector<64x64xf32>
    %cst_16 = arith.constant dense<0.000000e+00> : vector<64x16xf32>
    %15 = tpu.matmul %14, %3, %cst_16 {dimension_numbers = #tpu.dot_dimension_numbers<[1], [0], [0], [1], [0, 0, 1, 1], [], []>} : vector<64x64xf32>, vector<64x16xf32>, vector<64x16xf32> -> vector<64x16xf32>
    %c1_17 = arith.constant 1 : index
    %c0_18 = arith.constant 0 : index
    %c0_19 = arith.constant 0 : index
    %16 = vector.load %arg2[%c1_17, %c0_18, %c0_19] : memref<3x64x1xf32, #tpu.memory_space<vmem>>, vector<1x64x1xf32>
    %17 = vector.shape_cast %16 : vector<1x64x1xf32> to vector<64x1xf32>
    %18 = vector.broadcast %17 : vector<64x1xf32> to vector<64x16xf32>
    %19 = arith.addf %15, %18 : vector<64x16xf32>
    %c2 = arith.constant 2 : index
    %c0_20 = arith.constant 0 : index
    %c0_21 = arith.constant 0 : index
    %20 = vector.load %arg1[%c2, %c0_20, %c0_21] : memref<3x64x64xf32, #tpu.memory_space<vmem>>, vector<1x64x64xf32>
    %21 = vector.shape_cast %20 : vector<1x64x64xf32> to vector<64x64xf32>
    %cst_22 = arith.constant dense<0.000000e+00> : vector<64x16xf32>
    %22 = tpu.matmul %21, %5, %cst_22 {dimension_numbers = #tpu.dot_dimension_numbers<[1], [0], [0], [1], [0, 0, 1, 1], [], []>} : vector<64x64xf32>, vector<64x16xf32>, vector<64x16xf32> -> vector<64x16xf32>
    %c2_23 = arith.constant 2 : index
    %c0_24 = arith.constant 0 : index
    %c0_25 = arith.constant 0 : index
    %23 = vector.load %arg2[%c2_23, %c0_24, %c0_25] : memref<3x64x1xf32, #tpu.memory_space<vmem>>, vector<1x64x1xf32>
    %24 = vector.shape_cast %23 : vector<1x64x1xf32> to vector<64x1xf32>
    %25 = vector.broadcast %24 : vector<64x1xf32> to vector<64x16xf32>
    %26 = arith.addf %22, %25 : vector<64x16xf32>
    %27 = vector.extract_strided_slice %12 {offsets = [0, 0], sizes = [16, 16], strides = [1, 1]} : vector<64x16xf32> to vector<16x16xf32>
    %28 = vector.extract_strided_slice %19 {offsets = [0, 0], sizes = [16, 16], strides = [1, 1]} : vector<64x16xf32> to vector<16x16xf32>
    %29 = vector.extract_strided_slice %26 {offsets = [0, 0], sizes = [16, 16], strides = [1, 1]} : vector<64x16xf32> to vector<16x16xf32>
    %cst_26 = arith.constant dense<0.000000e+00> : vector<16x16xf32>
    %30 = tpu.matmul %27, %28, %cst_26 {dimension_numbers = #tpu.dot_dimension_numbers<[0], [0], [1], [1], [0, 1, 1, 1], [], []>} : vector<16x16xf32>, vector<16x16xf32>, vector<16x16xf32> -> vector<16x16xf32>
    %cst_27 = arith.constant dense<0.000000e+00> : vector<16x16xf32>
    %31 = tpu.matmul %30, %29, %cst_27 {dimension_numbers = #tpu.dot_dimension_numbers<[1], [1], [0], [0], [0, 0, 1, 0], [], []>} : vector<16x16xf32>, vector<16x16xf32>, vector<16x16xf32> -> vector<16x16xf32>
    %32 = vector.extract_strided_slice %12 {offsets = [16, 0], sizes = [16, 16], strides = [1, 1]} : vector<64x16xf32> to vector<16x16xf32>
    %33 = vector.extract_strided_slice %19 {offsets = [16, 0], sizes = [16, 16], strides = [1, 1]} : vector<64x16xf32> to vector<16x16xf32>
    %34 = vector.extract_strided_slice %26 {offsets = [16, 0], sizes = [16, 16], strides = [1, 1]} : vector<64x16xf32> to vector<16x16xf32>
    %cst_28 = arith.constant dense<0.000000e+00> : vector<16x16xf32>
    %35 = tpu.matmul %32, %33, %cst_28 {dimension_numbers = #tpu.dot_dimension_numbers<[0], [0], [1], [1], [0, 1, 1, 1], [], []>} : vector<16x16xf32>, vector<16x16xf32>, vector<16x16xf32> -> vector<16x16xf32>
    %cst_29 = arith.constant dense<0.000000e+00> : vector<16x16xf32>
    %36 = tpu.matmul %35, %34, %cst_29 {dimension_numbers = #tpu.dot_dimension_numbers<[1], [1], [0], [0], [0, 0, 1, 0], [], []>} : vector<16x16xf32>, vector<16x16xf32>, vector<16x16xf32> -> vector<16x16xf32>
    %37 = vector.extract_strided_slice %12 {offsets = [32, 0], sizes = [16, 16], strides = [1, 1]} : vector<64x16xf32> to vector<16x16xf32>
    %38 = vector.extract_strided_slice %19 {offsets = [32, 0], sizes = [16, 16], strides = [1, 1]} : vector<64x16xf32> to vector<16x16xf32>
    %39 = vector.extract_strided_slice %26 {offsets = [32, 0], sizes = [16, 16], strides = [1, 1]} : vector<64x16xf32> to vector<16x16xf32>
    %cst_30 = arith.constant dense<0.000000e+00> : vector<16x16xf32>
    %40 = tpu.matmul %37, %38, %cst_30 {dimension_numbers = #tpu.dot_dimension_numbers<[0], [0], [1], [1], [0, 1, 1, 1], [], []>} : vector<16x16xf32>, vector<16x16xf32>, vector<16x16xf32> -> vector<16x16xf32>
    %cst_31 = arith.constant dense<0.000000e+00> : vector<16x16xf32>
    %41 = tpu.matmul %40, %39, %cst_31 {dimension_numbers = #tpu.dot_dimension_numbers<[1], [1], [0], [0], [0, 0, 1, 0], [], []>} : vector<16x16xf32>, vector<16x16xf32>, vector<16x16xf32> -> vector<16x16xf32>
    %42 = vector.extract_strided_slice %12 {offsets = [48, 0], sizes = [16, 16], strides = [1, 1]} : vector<64x16xf32> to vector<16x16xf32>
    %43 = vector.extract_strided_slice %19 {offsets = [48, 0], sizes = [16, 16], strides = [1, 1]} : vector<64x16xf32> to vector<16x16xf32>
    %44 = vector.extract_strided_slice %26 {offsets = [48, 0], sizes = [16, 16], strides = [1, 1]} : vector<64x16xf32> to vector<16x16xf32>
    %cst_32 = arith.constant dense<0.000000e+00> : vector<16x16xf32>
    %45 = tpu.matmul %42, %43, %cst_32 {dimension_numbers = #tpu.dot_dimension_numbers<[0], [0], [1], [1], [0, 1, 1, 1], [], []>} : vector<16x16xf32>, vector<16x16xf32>, vector<16x16xf32> -> vector<16x16xf32>
    %cst_33 = arith.constant dense<0.000000e+00> : vector<16x16xf32>
    %46 = tpu.matmul %45, %44, %cst_33 {dimension_numbers = #tpu.dot_dimension_numbers<[1], [1], [0], [0], [0, 0, 1, 0], [], []>} : vector<16x16xf32>, vector<16x16xf32>, vector<16x16xf32> -> vector<16x16xf32>
    %47 = tpu.concatenate %31, %36, %41, %46 in 0 : vector<16x16xf32>, vector<16x16xf32>, vector<16x16xf32>, vector<16x16xf32> -> vector<64x16xf32>
    %48 = arith.addf %47, %1 : vector<64x16xf32>
    %c0_34 = arith.constant 0 : index
    %c0_35 = arith.constant 0 : index
    %c0_36 = arith.constant 0 : index
    %49 = vector.load %arg6[%c0_34, %c0_35, %c0_36] : memref<1x64x16xf32, #tpu.memory_space<vmem>>, vector<1x64x16xf32>
    %50 = vector.shape_cast %49 : vector<1x64x16xf32> to vector<64x16xf32>
    %51 = vector.shape_cast %48 : vector<64x16xf32> to vector<1x64x16xf32>
    tpu.vector_store %arg6[%c0_34, %c0_35, %c0_36], %51 {strides = array<i32>} : memref<1x64x16xf32, #tpu.memory_space<vmem>>, vector<1x64x16xf32>,
    return
  }
  func.func @transform_0(%arg0: i32) -> (i32, i32, i32) {
    %c0_i32 = arith.constant 0 : i32
    %c0_i32_0 = arith.constant 0 : i32
    %c0_i32_1 = arith.constant 0 : i32
    %c0_i32_2 = arith.constant 0 : i32
    return %c0_i32, %c0_i32_0, %c0_i32_1 : i32, i32, i32
  }
  func.func @transform_1(%arg0: i32) -> (i32, i32, i32) {
    %c0_i32 = arith.constant 0 : i32
    %c0_i32_0 = arith.constant 0 : i32
    %c0_i32_1 = arith.constant 0 : i32
    %c0_i32_2 = arith.constant 0 : i32
    return %c0_i32, %c0_i32_0, %c0_i32_1 : i32, i32, i32
  }
  func.func @transform_2(%arg0: i32) -> (i32, i32, i32) {
    %c0_i32 = arith.constant 0 : i32
    %c0_i32_0 = arith.constant 0 : i32
    %c0_i32_1 = arith.constant 0 : i32
    return %arg0, %c0_i32, %c0_i32_0 : i32, i32, i32
  }
  func.func @transform_3(%arg0: i32) -> (i32, i32, i32) {
    %c0_i32 = arith.constant 0 : i32
    %c0_i32_0 = arith.constant 0 : i32
    %c0_i32_1 = arith.constant 0 : i32
    return %arg0, %c0_i32, %c0_i32_0 : i32, i32, i32
  }
  func.func @transform_4(%arg0: i32) -> (i32, i32, i32) {
    %c0_i32 = arith.constant 0 : i32
    %c0_i32_0 = arith.constant 0 : i32
    %c0_i32_1 = arith.constant 0 : i32
    return %arg0, %c0_i32, %c0_i32_0 : i32, i32, i32
  }
  func.func @transform_5(%arg0: i32) -> (i32, i32, i32) {
    %c0_i32 = arith.constant 0 : i32
    %c0_i32_0 = arith.constant 0 : i32
    %c0_i32_1 = arith.constant 0 : i32
    return %arg0, %c0_i32, %c0_i32_0 : i32, i32, i32
  }
}

</mosaic_0001>

<bundles_post_ra>
// kernel: multi_head_attention.1
= control target key start
LH: loop header
LB: loop body
LE: loop exit
PB: predicated region body
PF: predicated region fallthrough
CT: control target
= control target key end

     0   :  { %s2112_s0 = inlined_call_operand.vmem [shape: f32[3,64,64], index: 0, kind: input, shape index: {}]   ;;  %s2113_s1 = inlined_call_operand.vmem [shape: f32[3,64,1], index: 1, kind: input, shape index: {}]   ;;  %s2114_s2 = inlined_call_operand.hbm [shape: f32[2,64,16], index: 2, kind: input, shape index: {}]   ;;  %s2115_s3 = inlined_call_operand.hbm [shape: f32[2,64,16], index: 3, kind: input, shape index: {}]   ;;  %s2116_s4 = inlined_call_operand.hbm [shape: f32[2,64,16], index: 4, kind: input, shape index: {}]   ;;  %s2117_s5 = inlined_call_operand.hbm [shape: f32[2,64,16], index: 5, kind: output, shape index: {}]  }
   0x1   :  { %2124 = sst [smem:[#allocation15_spill]] %s2114_s2 }
   0x2   :  { %2125 = sst [smem:[#allocation16_spill]] %s2115_s3 }
   0x3   :  { %10 = vsyncpa [#allocation3], 0 }
   0x4   :  { %12 = vsyncpa [#allocation3 + $0x1], 0 }
   0x5   :  { %13 = vsyncpa [#allocation6], 0 }
   0x6   :  { %15 = vsyncpa [#allocation6 + $0x1], 0 }
   0x7   :  { %16 = vsyncpa [#allocation4], 0 }
   0x8   :  { %18 = vsyncpa [#allocation4 + $0x1], 0  ;;  %s1621_s18 = smov 0   ;;  %s1623_s19 = smov 0  }
   0x9   :  { %s1625_s20 = smov 0   ;;  %s1627_s21 = smov 0  }
   0xa LB: > { %2126 = sst [smem:[#allocation12_spill]] %s1580_s20  ;;  %s1642_s22 = sadd.s32 4294967295, %s1584_s21   ;;  %s1584_s21 = sphi %s1627_s21, %s2138_s21   ;;  %s1580_s20 = sphi %s1625_s20, %s2140_s20   ;;  %s1576_s19 = sphi %s1623_s19, %s2142_s19   ;;  %s1572_s18 = sphi %s1621_s18, %s2141_s18  }
   0xb   : > { %s1251_s23 = sadd.s32 4294967294, %s1584_s21   ;;  %s1646_s24 = sadd.s32 1, %s1584_s21  }
   0xc   : > { %2127 = sst [smem:[#allocation13_spill]] %s1646_s24  ;;  %s73_s25 = sadd.s32 1, %s1580_s20 }
   0xd   : > { %s70_s26 = ssub.s32 %s1584_s21, %s1646_s24  ;;  %p80_p0 = scmp.ne.s32.totalorder %s1580_s20, %s1576_s19 }
   0xe   : > { %p71_p1 = scmp.eq.s32.totalorder %s70_s26, 0  ;;  %p81_p2 = scmp.eq.s32.totalorder %s1584_s21, 0 }
   0xf   : > { %p86_p3 = scmp.ne.s32.totalorder %s1576_s19, %s1572_s18  ;;  %p87_p4 = scmp.eq.s32.totalorder %s1642_s22, 0 }
  0x10   : > { %s1658_s27 = scalar_select %p71_p1, %s1580_s20, %s73_s25  }
  0x11   : > { %p82_p5 = por %p81_p2, %p80_p0  ;;  %p1660_p6 = por %p87_p4, %p86_p3 }
  0x12   : > { %2128 = sst [smem:[#allocation14_spill]] %s1658_s27  ;;  %p162_p7 = scmp.eq.s32.totalorder %s1642_s22, 1 }
  0x13   : > { %p168_p8 = scmp.eq.s32.totalorder %s1251_s23, 1  ;;  %p1253_p9 = scmp.ge.s32.totalorder %s1584_s21, 2 }
  0x14   : > { %p1381_p10 = scmp.lt.s32.totalorder %s1584_s21, 2  ;;  %p1667_p11 = por %p162_p7, %p80_p0 }
  0x15   : > { %p1671_p12 = por %p168_p8, %p86_p3  ;;  %s2118_s6 = sand.u32 1, %s1580_s20  }
  0x16   : > { %s1677_s7 = sshll.u32 %s1584_s21, 6  ;;  %s1681_s8 = sshll.u32 %s2118_s6, 6 }
  0x17   : > { %p1683_p13 = pnand %p1381_p10, %p82_p5  ;;  %s216_s10 = sand.u32 1, %s1584_s21  }
  0x18   : > { %s2133_s3 = sld [smem:[#allocation16_spill]]  ;;  %s220_s14 = scalar_lea.vmem [#allocation5], %s1681_s8 }
  0x19   : > { %s228_s15 = sshll.u32 %s220_s14, 4  ;;  %p1263_p0 = scmp.ge.s32.totalorder %s1584_s21, 1  ;;  %s229_s15 = int_to_ptr.vmem [resolvable:$true] %s228_s15 }
  0x1a   : > { %s1694_s17 = scalar_lea.sflag [#allocation6], %s216_s10  ;;  %p1428_p2 = pneg %p1683_p13 }
  0x1e   : > { %s225_s13 = scalar_lea.hbm %s2133_s3, %s1677_s7  ;;  %s1431_s12 = scalar_lea.hbm %s2133_s3, 128 }
  0x1f   : > { %s226_s16 = sshll.u32 %s225_s13, 4  ;;  %s227_s16 = int_to_ptr.hbm [resolvable:$true] %s226_s16 }
  0x20   : > { %s1424_s23 = sshra.s32 %s227_s16, 4  ;;  %s1425_s23 = int_to_ptr.hbm [resolvable:$true] %s1424_s23 }
  0x21   : > { %s1426_s25 = scalar_lea.hbm %s1425_s23, 64  ;;  %p1432_p5 = scmp.lt.s32.totalorder %s1425_s23, %s2133_s3 }
  0x22   : > { %p1427_p1 = scmp.ne.s32.totalorder %s1425_s23, %s1426_s25  ;;  %p1433_p7 = scmp.lt.s32.totalorder %s1431_s12, %s1426_s25 }
  0x24   : > { %p1429_p3 = pnand %p1428_p2, %p1427_p1  ;;  %p1434_p8 = por %p1433_p7, %p1432_p5 }
  0x26   : > { %p1430_p4 = pneg %p1429_p3 }
  0x28   : > { %p1435_p10 = pnand %p1434_p8, %p1430_p4 }
  0x2a   : > { %1438 = shalt.err (!%p1435_p10)
}
  0x2b   : > { %s2121_s10 = smov 128   ;;  %s1587_s6 = smov 8  }
  0x2c   : > { %1373 = dma.hbm_to_vmem [thread:$0]  (!%p1683_p13), %s227_s16, 1024, %s229_s15, %s1694_s17, %s2121_s10, %s2121_s10, %s1587_s6  }
  0x2d   : > { %p258_p1 = scmp.lt.s32.totalorder %s1584_s21, 3  ;;  %s2134_s2 = sld [smem:[#allocation15_spill]] }
  0x2e   : > { %s198_s13 = scalar_lea.vmem [#allocation2], %s1681_s8  ;;  %s2136_s3 = sand.u32 1, %s1580_s20  }
  0x2f   : > { %p1720_p3 = pnand %p1263_p0, %p258_p1  ;;  %s206_s14 = sshll.u32 %s198_s13, 4  ;;  %s207_s14 = int_to_ptr.vmem [resolvable:$true] %s206_s14 }
  0x30   : > { %s195_s27 = scalar_lea.sflag [#allocation3], %s2136_s3 }
  0x33   : > { %s203_s26 = scalar_lea.hbm %s2134_s2, %s1677_s7  ;;  %s1461_s25 = scalar_lea.hbm %s2134_s2, 128 }
  0x34   : > { %s204_s12 = sshll.u32 %s203_s26, 4  ;;  %s205_s12 = int_to_ptr.hbm [resolvable:$true] %s204_s12 }
  0x35   : > { %s1454_s24 = sshra.s32 %s205_s12, 4  ;;  %s1455_s24 = int_to_ptr.hbm [resolvable:$true] %s1454_s24 }
  0x36   : > { %s1456_s15 = scalar_lea.hbm %s1455_s24, 64  ;;  %p1462_p0 = scmp.lt.s32.totalorder %s1455_s24, %s2134_s2 }
  0x37   : > { %p1457_p4 = scmp.ne.s32.totalorder %s1455_s24, %s1456_s15  ;;  %p1463_p8 = scmp.lt.s32.totalorder %s1461_s25, %s1456_s15 }
  0x39   : > { %p1459_p5 = pnand %p1457_p4, %p1428_p2  ;;  %p1464_p10 = por %p1463_p8, %p1462_p0 }
  0x3b   : > { %p1460_p7 = pneg %p1459_p5 }
  0x3d   : > { %p1465_p1 = pnand %p1464_p10, %p1460_p7 }
  0x3f   : > { %1468 = shalt.err (!%p1465_p1)
}
  0x40   : > { %s2137_s3 = smov 128   ;;  %s247_s23 = scalar_lea.hbm %s2116_s4, %s1677_s7 }
  0x41   : > { %1370 = dma.hbm_to_vmem [thread:$0]  (!%p1683_p13), %s205_s12, 1024, %s207_s14, %s195_s27, %s2137_s3, %s2137_s3, %s1587_s6  }
  0x42   : > { %s242_s20 = scalar_lea.vmem [#allocation7], %s1681_s8  ;;  %s248_s24 = sshll.u32 %s247_s23, 4  ;;  %s249_s24 = int_to_ptr.hbm [resolvable:$true] %s248_s24 }
  0x43   : > { %s250_s10 = sshll.u32 %s242_s20, 4  ;;  %s1484_s15 = sshra.s32 %s249_s24, 4  ;;  %s251_s10 = int_to_ptr.vmem [resolvable:$true] %s250_s10  ;;  %s1485_s15 = int_to_ptr.hbm [resolvable:$true] %s1484_s15 }
  0x44   : > { %s1486_s25 = scalar_lea.hbm %s1485_s15, 64  ;;  %s1491_s27 = scalar_lea.hbm %s2116_s4, 128 }
  0x45   : > { %p1487_p4 = scmp.ne.s32.totalorder %s1485_s15, %s1486_s25  ;;  %p1492_p0 = scmp.lt.s32.totalorder %s1485_s15, %s2116_s4 }
  0x46   : > { %p1493_p8 = scmp.lt.s32.totalorder %s1491_s27, %s1486_s25 }
  0x47   : > { %p1489_p5 = pnand %p1487_p4, %p1428_p2 }
  0x48   : > { %p1494_p10 = por %p1493_p8, %p1492_p0 }
  0x49   : > { %p1490_p7 = pneg %p1489_p5 }
  0x4b   : > { %p1495_p1 = pnand %p1494_p10, %p1490_p7 }
  0x4d   : > { %1498 = shalt.err (!%p1495_p1)
}
  0x4e   : > { %1376 = dma.hbm_to_vmem [thread:$0]  (!%p1683_p13), %s249_s24, 1024, %s251_s10, %s1694_s17, %s2137_s3, %s2137_s3, %s1587_s6  }
  0x4f   : > { %262 = sbr.rel (%p1720_p3) target bundleno = 962 (0x3c2), region = 40  ;;  %s1764_s2 = sand.u32 (!%p1720_p3), 1, %s1576_s19  }
  0x50   : > { %s1767_s20 = sshll.u32 (!%p1720_p3), %s1764_s2, 6  ;;  %s265_s7 = scalar_lea.sflag (!%p1720_p3), [#allocation3], %s1764_s2 }
  0x51   : > { %s1771_s8 = scalar_lea.vmem (!%p1720_p3), [#allocation2], %s1767_s20 }
  0x54   : > { %1559 = dma.done.wait (%p1660_p6), %s265_s7, 1024  }
  0x55   : > { %1561 = vsyncadd (%p1660_p6), %s265_s7, 4294966272  ;;  %s274_s6 = sand.u32 1, %s1642_s22   ;;  %s1779_s17 = scalar_lea.vmem [#allocation5], %s1767_s20 }
  0x56   : > { %s275_s9 = scalar_lea.sflag [#allocation6], %s274_s6 }
  0x57   : > { %1563 = dma.done.wait (%p1660_p6), %s275_s9, 2048  }
  0x58   : > { %1565 = vsyncadd (%p1660_p6), %s275_s9, 4294965248  ;;  %v1588_v0 = vmov 0   ;;  %v358_v1 = vld [vmem:[%s2113_s1] sm:$0xff]  ;;  %v1791_v2 = vld [vmem:[%s1771_s8 + $0x38] sm:$0xff]  ;;  %s1796_s28 = scalar_lea.vmem [#allocation7], %s1767_s20  ;;  %vm406_vm0 = vcmask 523264  }
  0x59   : > { %1421 = vset.pattern.permute.xlu0 %v1588_v0  ;;  %1422 = vset.pattern.permute.xlu1 %v1588_v0  ;;  %v341_v3 = vld [vmem:[%s1779_s17 + $0x38] sm:$0xff]  ;;  %v1800_v5 = vld [vmem:[%s1771_s8 + $0x30] sm:$0xff]  ;;  %v1805_v8 = vld [vmem:[%s1771_s8 + $0x28] sm:$0xff]  ;;  %vm750_vm1 = vcmask 130048   ;;  %s1120_s15 = scalar_lea.sflag [#allocation4], %s1764_s2  ;;  %s1534_s12 = scalar_lea.hbm %s2117_s5, 128 }
  0x5a   : > { %368 = vperm.xlu0 %1421, %v358_v1   ;;  %439 = vmatpush.msra.mxu0 %v1791_v2  ;;  %v349_v4 = vld [vmem:[%s1796_s28 + $0x38] sm:$0xff]  ;;  %v340_v6 = vld [vmem:[%s1779_s17 + $0x30] sm:$0xff]  ;;  %v339_v9 = vld [vmem:[%s1779_s17 + $0x28] sm:$0xff] }
  0x5b   : > { %562 = vmatpush.msra.mxu1 %v341_v3  ;;  %685 = vmatpush.msra.mxu2 %v349_v4  ;;  %v348_v7 = vld [vmem:[%s1796_s28 + $0x30] sm:$0xff]  ;;  %v347_v10 = vld [vmem:[%s1796_s28 + $0x28] sm:$0xff]  ;;  %v1811_v11 = vld [vmem:[%s1771_s8 + $0x20] sm:$0xff] }
  0x5c   : > { %440 = vmatpush.msra.mxu0 %v1800_v5  ;;  %v338_v12 = vld [vmem:[%s1779_s17 + $0x20] sm:$0xff]  ;;  %v359_v14 = vld [vmem:[%s2113_s1 + $0x8] sm:$0xff]  ;;  %v1820_v15 = vld [vmem:[%s1771_s8 + $0x18] sm:$0xff] }
  0x5d   : > { %563 = vmatpush.msra.mxu1 %v340_v6  ;;  %686 = vmatpush.msra.mxu2 %v348_v7  ;;  %v346_v13 = vld [vmem:[%s1796_s28 + $0x20] sm:$0xff]  ;;  %v337_v16 = vld [vmem:[%s1779_s17 + $0x18] sm:$0xff]  ;;  %v1826_v18 = vld [vmem:[%s1771_s8 + $0x10] sm:$0xff] }
  0x5e   : > { %441 = vmatpush.msra.mxu0 %v1805_v8  ;;  %v345_v17 = vld [vmem:[%s1796_s28 + $0x18] sm:$0xff]  ;;  %v336_v19 = vld [vmem:[%s1779_s17 + $0x10] sm:$0xff]  ;;  %v1832_v21 = vld [vmem:[%s1771_s8 + $0x8] sm:$0xff] }
  0x5f   : > { %564 = vmatpush.msra.mxu1 %v339_v9  ;;  %687 = vmatpush.msra.mxu2 %v347_v10  ;;  %v344_v20 = vld [vmem:[%s1796_s28 + $0x10] sm:$0xff]  ;;  %v335_v22 = vld [vmem:[%s1779_s17 + $0x8] sm:$0xff]  ;;  %v1841_v25 = vld [vmem:[%s1771_s8] sm:$0xff] }
  0x60   : > { %442 = vmatpush.msra.mxu0 %v1811_v11  ;;  %v343_v23 = vld [vmem:[%s1796_s28 + $0x8] sm:$0xff]  ;;  %v334_v26 = vld [vmem:[%s1779_s17] sm:$0xff]  ;;  %v361_v36 = vld [vmem:[%s2113_s1 + $0x18] sm:$0xff] }
  0x61   : > { %565 = vmatpush.msra.mxu1 %v338_v12  ;;  %688 = vmatpush.msra.mxu2 %v346_v13  ;;  %v1285_v24 = vld [vmem:[%s2113_s1 + $0x48] sm:$0xff]  ;;  %v342_v27 = vld [vmem:[%s1796_s28] sm:$0xff]  ;;  %v360_v37 = vld [vmem:[%s2113_s1 + $0x10] sm:$0xff]  ;;  %s2043_s28 = scalar_lea.vmem [#allocation8], %s1767_s20  ;;  %s1356_s20 = sshll.u32 %s1642_s22, 6 }
  0x62   : > { %373 = vperm.xlu0 %1421, %v359_v14   ;;  %443 = vmatpush.msra.mxu0 %v1820_v15  ;;  %v350_v28 = vld [vmem:[%s2112_s0] sm:$0xff]  ;;  %v1309_v31 = vld [vmem:[%s2113_s1 + $0x88] sm:$0xff]  ;;  %v352_v38 = vld [vmem:[%s2112_s0 + $0x10] sm:$0xff]  ;;  %s1131_s23 = scalar_lea.hbm %s2117_s5, %s1356_s20  ;;  %s1132_s10 = sshll.u32 %s2043_s28, 4  ;;  %s1133_s10 = int_to_ptr.vmem [resolvable:$true] %s1132_s10 }
  0x63   : > { %566 = vmatpush.msra.mxu1 %v337_v16  ;;  %689 = vmatpush.msra.mxu2 %v345_v17  ;;  %v1276_v29 = vld [vmem:[%s2112_s0 + $0x40] sm:$0xff]  ;;  %v351_v33 = vld [vmem:[%s2112_s0 + $0x8] sm:$0xff]  ;;  %v1278_v39 = vld [vmem:[%s2112_s0 + $0x50] sm:$0xff]  ;;  %s1134_s24 = sshll.u32 %s1131_s23, 4  ;;  %s1135_s24 = int_to_ptr.hbm [resolvable:$true] %s1134_s24 }
  0x64   : > { %444 = vmatpush.msra.mxu0 %v1826_v18  ;;  %497 = vperm.xlu1 %1422, %v1285_v24   ;;  %v1300_v30 = vld [vmem:[%s2112_s0 + $0x80] sm:$0xff]  ;;  %v1277_v34 = vld [vmem:[%s2112_s0 + $0x48] sm:$0xff]  ;;  %v1302_v40 = vld [vmem:[%s2112_s0 + $0x90] sm:$0xff]  ;;  %s1528_s25 = sshra.s32 %s1135_s24, 4  ;;  %s1529_s25 = int_to_ptr.hbm [resolvable:$true] %s1528_s25 }
  0x65   : > { %567 = vmatpush.msra.mxu1 %v336_v19  ;;  %690 = vmatpush.msra.mxu2 %v344_v20  ;;  %v1284_v32 = vld [vmem:[%s2113_s1 + $0x40] sm:$0xff]  ;;  %v1301_v35 = vld [vmem:[%s2112_s0 + $0x88] sm:$0xff]  ;;  %v1286_v41 = vld [vmem:[%s2113_s1 + $0x50] sm:$0xff]  ;;  %s1530_s26 = scalar_lea.hbm %s1529_s25, 64  ;;  %p1535_p3 = scmp.lt.s32.totalorder %s1529_s25, %s2117_s5 }
  0x66   : > { %445 = vmatpush.msra.mxu0 %v1832_v21  ;;  %v353_v42 = vld [vmem:[%s2112_s0 + $0x18] sm:$0xff]  ;;  %v354_v46 = vld [vmem:[%s2112_s0 + $0x20] sm:$0xff]  ;;  %v355_v49 = vld [vmem:[%s2112_s0 + $0x28] sm:$0xff]  ;;  %p1531_p6 = scmp.ne.s32.totalorder %s1529_s25, %s1530_s26  ;;  %p1536_p4 = scmp.lt.s32.totalorder %s1534_s12, %s1530_s26 }
  0x67   : > { %568 = vmatpush.msra.mxu1 %v335_v22  ;;  %691 = vmatpush.msra.mxu2 %v343_v23  ;;  %v1279_v43 = vld [vmem:[%s2112_s0 + $0x58] sm:$0xff]  ;;  %v1280_v47 = vld [vmem:[%s2112_s0 + $0x60] sm:$0xff]  ;;  %v1281_v50 = vld [vmem:[%s2112_s0 + $0x68] sm:$0xff] }
  0x68   : > { %446 = vmatpush.msra.mxu0 %v1841_v25  ;;  %v1303_v44 = vld [vmem:[%s2112_s0 + $0x98] sm:$0xff]  ;;  %v362_v48 = vld [vmem:[%s2113_s1 + $0x20] sm:$0xff]  ;;  %v1310_v51 = vld [vmem:[%s2113_s1 + $0x90] sm:$0xff]  ;;  %p1532_p13 = pnand %p1531_p6, %p1667_p11  ;;  %p1537_p5 = por %p1536_p4, %p1535_p3 }
  0x69   : > { %569 = vmatpush.msra.mxu1 %v334_v26  ;;  %692 = vmatpush.msra.mxu2 %v342_v27  ;;  %v1311_v45 = vld [vmem:[%s2113_s1 + $0x98] sm:$0xff]  ;;  %v356_v52 = vld [vmem:[%s2112_s0 + $0x30] sm:$0xff]  ;;  %v363_v54 = vld [vmem:[%s2113_s1 + $0x28] sm:$0xff] }
  0x6a   : > { %1268 = vmatmul.msk.f32.vlgmr.msra.gmra.mxu0 %vm406_vm0, %v350_v28  ;;  %1292 = vmatmul.msk.f32.vlgmr.msra.gmra.mxu1 %vm406_vm0, %v1276_v29  ;;  %v1282_v53 = vld [vmem:[%s2112_s0 + $0x70] sm:$0xff]  ;;  %v357_v55 = vld [vmem:[%s2112_s0 + $0x38] sm:$0xff]  ;;  %v1289_v60 = vld [vmem:[%s2113_s1 + $0x68] sm:$0xff]  ;;  %p1533_p2 = pneg %p1532_p13 }
  0x6b   : > { %1316 = vmatmul.msk.f32.vlgmr.msra.gmra.mxu2 %vm406_vm0, %v1300_v30  ;;  %620 = vperm.xlu0 %1421, %v1309_v31   ;;  %v1283_v56 = vld [vmem:[%s2112_s0 + $0x78] sm:$0xff]  ;;  %v364_v57 = vld [vmem:[%s2113_s1 + $0x30] sm:$0xff] }
  0x6c   : > { %492 = vperm.xlu1 %1422, %v1284_v32   ;;  %v1287_v58 = vld [vmem:[%s2113_s1 + $0x58] sm:$0xff]  ;;  %v1290_v62 = vld [vmem:[%s2113_s1 + $0x70] sm:$0xff]  ;;  %p1538_p7 = pnand %p1537_p5, %p1533_p2 }
  0x6d   : > { %v365_v59 = vld [vmem:[%s2113_s1 + $0x38] sm:$0xff] }
  0x6e   : > { %v1291_v61 = vld [vmem:[%s2113_s1 + $0x78] sm:$0xff] }
  0x72   : > { %1269 = vmatmul.msk.f32.gmra.mxu0 %vm406_vm0, %v351_v33  ;;  %1293 = vmatmul.msk.f32.gmra.mxu1 %vm406_vm0, %v1277_v34 }
  0x73   : > { %1317 = vmatmul.msk.f32.gmra.mxu2 %vm406_vm0, %v1301_v35  ;;  %383 = vperm.xlu0 %1421, %v361_v36  }
  0x74   : > { %378 = vperm.xlu1 %1422, %v360_v37  }
  0x7a   : > { %1270 = vmatmul.msk.f32.gmra.mxu0 %vm406_vm0, %v352_v38  ;;  %1294 = vmatmul.msk.f32.gmra.mxu1 %vm406_vm0, %v1278_v39 }
  0x7b   : > { %1318 = vmatmul.msk.f32.gmra.mxu2 %vm406_vm0, %v1302_v40  ;;  %502 = vperm.xlu0 %1421, %v1286_v41  }
  0x7c   : > { %507 = vperm.xlu1 %1422, %v1287_v58  }
  0x82   : > { %1271 = vmatmul.msk.f32.gmra.mxu0 %vm406_vm0, %v353_v42  ;;  %1295 = vmatmul.msk.f32.gmra.mxu1 %vm406_vm0, %v1279_v43 }
  0x83   : > { %1319 = vmatmul.msk.f32.gmra.mxu2 %vm406_vm0, %v1303_v44  ;;  %630 = vperm.xlu0 %1421, %v1311_v45  }
  0x8a   : > { %1272 = vmatmul.msk.f32.gmra.mxu0 %vm406_vm0, %v354_v46  ;;  %1296 = vmatmul.msk.f32.gmra.mxu1 %vm406_vm0, %v1280_v47 }
  0x8b   : > { %388 = vperm.xlu0 %1421, %v362_v48  }
  0x92   : > { %1273 = vmatmul.msk.f32.gmra.mxu0 %vm406_vm0, %v355_v49  ;;  %1297 = vmatmul.msk.f32.gmra.mxu1 %vm406_vm0, %v1281_v50  ;;  %v1304_v49 = vld [vmem:[%s2112_s0 + $0xa0] sm:$0xff] }
  0x93   : > { %625 = vperm.xlu0 %1421, %v1310_v51   ;;  %1320 = vmatmul.msk.f32.gmra.mxu2 %vm406_vm0, %v1304_v49  ;;  %v1305_v51 = vld [vmem:[%s2112_s0 + $0xa8] sm:$0xff] }
  0x9a   : > { %1274 = vmatmul.msk.f32.gmra.mxu0 %vm406_vm0, %v356_v52  ;;  %1298 = vmatmul.msk.f32.gmra.mxu1 %vm406_vm0, %v1282_v53 }
  0x9b   : > { %393 = vperm.xlu0 %1421, %v363_v54   ;;  %1321 = vmatmul.msk.f32.gmra.mxu2 %vm406_vm0, %v1305_v51 }
  0xa2   : > { %1275 = vmatmul.msk.f32.gmra.mxu0 %vm406_vm0, %v357_v55  ;;  %1299 = vmatmul.msk.f32.gmra.mxu1 %vm406_vm0, %v1283_v56 }
  0xa3   : > { %398 = vperm.xlu0 %1421, %v364_v57  }
  0xab   : > { %403 = vperm.xlu0 %1421, %v365_v59  }
  0xb3   : > { %517 = vperm.xlu0 %1421, %v1289_v60   ;;  %v1306_v60 = vld [vmem:[%s2112_s0 + $0xb0] sm:$0xff] }
  0xb4   : > { %1322 = vmatmul.msk.f32.gmra.mxu2 %vm406_vm0, %v1306_v60 }
  0xbb   : > { %527 = vperm.xlu0 %1421, %v1291_v61   ;;  %v1307_v61 = vld [vmem:[%s2112_s0 + $0xb8] sm:$0xff] }
  0xbc   : > { %1323 = vmatmul.msk.f32.gmra.mxu2 %vm406_vm0, %v1307_v61 }
  0xc3   : > { %522 = vperm.xlu0 %1421, %v1290_v62   ;;  %v1308_v62 = vld [vmem:[%s2113_s1 + $0x80] sm:$0xff] }
  0xcc   : > { %v369_v63 = vpop.permute.xlu0 %368 }
  0xd4   : > { %v374_v1 = vpop.permute.xlu0 %373 }
  0xd6   : > { %v498_v4 = vpop.permute.xlu1 %497 }
  0xdd   : > { %v621_v3 = vpop.permute.xlu0 %620 }
  0xde   : > { %v493_v12 = vpop.permute.xlu1 %492 }
  0xe5   : > { %v384_v6 = vpop.permute.xlu0 %383 }
  0xe6   : > { %v379_v24 = vpop.permute.xlu1 %378 }
  0xe7   : > { %v448_v7 = vpop.f32.mrf.mxu0  ;;  %v571_v9 = vpop.f32.mrf.mxu1 }
  0xe8   : > { %v449_v10 = vadd.f32 %v448_v7, %v369_v63  ;;  %v572_v19 = vadd.f32 %v571_v9, %v493_v12  ;;  %v1288_v63 = vld [vmem:[%s2113_s1 + $0x60] sm:$0xff] }
  0xea   : > { %718 = vxpose.xlu2.b32.start [1/2] (short) (narrow) %v449_v10, 16 }
  0xed   : > { %v503_v13 = vpop.permute.xlu0 %502 }
  0xee   : > { %v1972_v14 = vpop.f32.mrf.mxu2 }
  0xef   : > { %v451_v16 = vpop.f32.mrf.mxu0  ;;  %v574_v17 = vpop.f32.mrf.mxu1 }
  0xf0   : > { %v452_v20 = vadd.f32 %v451_v16, %v374_v1  ;;  %v575_v22 = vadd.f32 %v574_v17, %v498_v4  ;;  %v1313_v1 = vld [vmem:[%s2113_s1 + $0xa8] sm:$0xff]  ;;  %v1315_v4 = vld [vmem:[%s2113_s1 + $0xb8] sm:$0xff] }
  0xf2   : > { %719 = vxpose.xlu2.b32.end [2/2] (short) (narrow) %v452_v20, 16  ;;  %771 = vmatpush.msra.mxu3 %v575_v22 }
  0xf4   : > { %772 = vmatpush.msra.mxu3 %v572_v19 }
  0xf5   : > { %v631_v23 = vpop.permute.xlu0 %630 }
  0xf6   : > { %v697_v26 = vpop.f32.mrf.mxu2 }
  0xf7   : > { %v698_v27 = vadd.f32 %v697_v26, %v621_v3  ;;  %v454_v28 = vpop.f32.mrf.mxu0  ;;  %v577_v29 = vpop.f32.mrf.mxu1  ;;  %v1312_v3 = vld [vmem:[%s2113_s1 + $0xa0] sm:$0xff] }
  0xf8   : > { %v455_v30 = vadd.f32 %v454_v28, %v379_v24  ;;  %v1974_v31 = vadd.f32 %v577_v29, %v503_v13  ;;  %v508_v13 = vpop.permute.xlu1 %507 }
  0xf9   : > { %1326 = vmatpush.xpose.msk.msrb.mxu3 %vm750_vm1, %v698_v27 }
  0xfa   : > { %815 = vxpose.xlu1.b32.start [1/2] (short) (narrow) %v455_v30, 16 }
  0xfd   : > { %v389_v32 = vpop.permute.xlu0 %388 }
  0xfe   : > { %v700_v33 = vpop.f32.mrf.mxu2 }
  0xff   : > { %v457_v34 = vpop.f32.mrf.mxu0  ;;  %v580_v36 = vpop.f32.mrf.mxu1 }
 0x100   : > { %v458_v35 = vadd.f32 %v457_v34, %v384_v6  ;;  %v581_v19 = vadd.f32 %v580_v36, %v508_v13  ;;  %v1314_v34 = vld [vmem:[%s2113_s1 + $0xb0] sm:$0xff] }
 0x102   : > { %816 = vxpose.xlu1.b32.end [2/2] (short) (narrow) %v458_v35, 16 }
 0x105   : > { %v626_v37 = vpop.permute.xlu0 %625 }
 0x106   : > { %v1977_v38 = vadd.f32 %v700_v33, %v626_v37  ;;  %v703_v39 = vpop.f32.mrf.mxu2 }
 0x107   : > { %v1979_v40 = vadd.f32 %v703_v39, %v631_v23  ;;  %v460_v41 = vpop.f32.mrf.mxu0  ;;  %v1981_v44 = vpop.f32.mrf.mxu1 }
 0x108   : > { %v461_v42 = vadd.f32 %v460_v41, %v389_v32 }
 0x10a   : > { %911 = vxpose.xlu0.b32.start [1/2] (short) (narrow) %v461_v42, 16 }
 0x10d   : > { %v394_v43 = vpop.permute.xlu0 %393 }
 0x10f   : > { %v463_v45 = vpop.f32.mrf.mxu0  ;;  %v586_v48 = vpop.f32.mrf.mxu1 }
 0x110   : > { %v464_v46 = vadd.f32 %v463_v45, %v394_v43 }
 0x112   : > { %912 = vxpose.xlu0.b32.end [2/2] (short) (narrow) %v464_v46, 16 }
 0x115   : > { %v399_v47 = vpop.permute.xlu0 %398 }
 0x116   : > { %v706_v23 = vpop.f32.mrf.mxu2 }
 0x117   : > { %v589_v52 = vpop.f32.mrf.mxu1 }
 0x11d   : > { %v404_v50 = vpop.permute.xlu0 %403 }
 0x11e   : > { %v709_v26 = vpop.f32.mrf.mxu2 }
 0x11f   : > { %v592_v55 = vpop.f32.mrf.mxu1 }
 0x125   : > { %v518_v53 = vpop.permute.xlu0 %517 }
 0x126   : > { %v1991_v54 = vadd.f32 %v586_v48, %v518_v53 }
 0x12d   : > { %v528_v56 = vpop.permute.xlu0 %527 }
 0x12e   : > { %v593_v57 = vadd.f32 %v592_v55, %v528_v56 }
 0x130   : > { %1059 = vmatpush.msrb.mxu1 %v593_v57 }
 0x135   : > { %v523_v58 = vpop.permute.xlu0 %522 }
 0x136   : > { %v590_v59 = vadd.f32 %v589_v52, %v523_v58 }
 0x138   : > { %1060 = vmatpush.msrb.mxu1 %v590_v59 }
 0x154   : > { %1423 = vset.pattern.permute.xlu2 %v1588_v0  ;;  %v466_v0 = vpop.f32.mrf.mxu0 }
 0x155   : > { %v467_v6 = vadd.f32 %v466_v0, %v399_v47 }
 0x15b   : > { %615 = vperm.xlu2 %1423, %v1308_v62  }
 0x15c   : > { %512 = vperm.xlu1 %1422, %v1288_v63   ;;  %v469_v9 = vpop.f32.mrf.mxu0 }
 0x15d   : > { %v470_v10 = vadd.f32 %v469_v9, %v404_v50 }
 0x164   : > { %640 = vperm.xlu1 %1422, %v1313_v1  }
 0x16c   : > { %635 = vperm.xlu1 %1422, %v1312_v3  }
 0x180   : > { %650 = vperm.xlu0 %1421, %v1315_v4  }
 0x181   : > { %1007 = vxpose.xlu2.b32.start [1/2] (short) (narrow) %v467_v6, 16 }
 0x183   : > { %v734_v7 = vpop.trf.xlu2 }
 0x184   : > { %1324 = vmatmul.msk.f32.vlgmr.msra.gmra.mxu3 %vm750_vm1, %v734_v7 }
 0x189   : > { %1008 = vxpose.xlu2.b32.end [2/2] (short) (narrow) %v470_v10, 16 }
 0x18b   : > { %v735_v12 = vpop.trf.xlu2 }
 0x18c   : > { %1325 = vmatmul.msk.f32.gmra.mxu3 %vm750_vm1, %v735_v12 }
 0x19e   : > { %v831_v20 = vpop.trf.xlu1 }
 0x1a6   : > { %v832_v22 = vpop.trf.xlu1 }
 0x1ae   : > { %v927_v30 = vpop.trf.xlu0 }
 0x1b5   : > { %v616_v16 = vpop.permute.xlu2 %615 }
 0x1b6   : > { %v695_v17 = vadd.f32 %v1972_v14, %v616_v16  ;;  %v712_v14 = vpop.f32.mrf.mxu2  ;;  %v928_v33 = vpop.trf.xlu0 }
 0x1b8   : > { %1327 = vmatpush.xpose.msk.msrb.mxu3 %vm750_vm1, %v695_v17 }
 0x1bc   : > { %867 = vmatpush.msra.mxu3 %v581_v19 }
 0x1be   : > { %868 = vmatpush.msra.mxu3 %v1974_v31  ;;  %v715_v31 = vpop.f32.mrf.mxu2 }
 0x1ce   : > { %v513_v24 = vpop.permute.xlu1 %512 }
 0x1cf   : > { %v584_v41 = vadd.f32 %v1981_v44, %v513_v24 }
 0x1d6   : > { %v641_v27 = vpop.permute.xlu1 %640 }
 0x1d7   : > { %v710_v28 = vadd.f32 %v709_v26, %v641_v27 }
 0x1d9   : > { %1338 = vmatpush.xpose.msk.msrb.mxu0 %vm750_vm1, %v710_v28 }
 0x1de   : > { %v636_v29 = vpop.permute.xlu1 %635 }
 0x1df   : > { %v707_v32 = vadd.f32 %v706_v23, %v636_v29 }
 0x1e1   : > { %1339 = vmatpush.xpose.msk.msrb.mxu0 %vm750_vm1, %v707_v32 }
 0x1f2   : > { %v651_v35 = vpop.permute.xlu0 %650  ;;  %645 = vperm.xlu2 %1423, %v1314_v34  }
 0x1f3   : > { %v716_v36 = vadd.f32 %v715_v31, %v651_v35 }
 0x1f5   : > { %1344 = vmatpush.xpose.msk.msrb.mxu2 %vm750_vm1, %v716_v36 }
 0x207   : > { %v774_v37 = vpop.f32.mrf.mxu3 }
 0x208   : > { %1328 = vmatmul.msk.f32.vlgmr.msrb.gmra.mxu3 %vm750_vm1, %v774_v37 }
 0x209   : > { %1332 = vmatpush.xpose.msk.msrb.mxu3 %vm750_vm1, %v1979_v40 }
 0x20d   : > { %1333 = vmatpush.xpose.msk.msrb.mxu3 %vm750_vm1, %v1977_v38 }
 0x20f   : > { %v777_v39 = vpop.f32.mrf.mxu3 }
 0x210   : > { %1329 = vmatmul.msk.f32.gmra.mxu3 %vm750_vm1, %v777_v39 }
 0x218   : > { %1330 = vmatmul.msk.f32.vlgmr.msra.gmra.mxu3 %vm750_vm1, %v831_v20 }
 0x219   : > { %963 = vmatpush.msra.mxu3 %v1991_v54 }
 0x21a   : > { %v1023_v42 = vpop.trf.xlu2 }
 0x21b   : > { %964 = vmatpush.msra.mxu3 %v584_v41  ;;  %1342 = vmatmul.msk.f32.vlgmr.msrb.gmra.mxu1 %vm750_vm1, %v1023_v42 }
 0x220   : > { %1331 = vmatmul.msk.f32.gmra.mxu3 %vm750_vm1, %v832_v22 }
 0x222   : > { %v1024_v40 = vpop.trf.xlu2 }
 0x223   : > { %1343 = vmatmul.msk.f32.gmra.mxu1 %vm750_vm1, %v1024_v40 }
 0x24c   : > { %v646_v38 = vpop.permute.xlu2 %645 }
 0x24d   : > { %v713_v43 = vadd.f32 %v712_v14, %v646_v38 }
 0x24f   : > { %1345 = vmatpush.xpose.msk.msrb.mxu2 %vm750_vm1, %v713_v43 }
 0x28b   : > { %v809_v45 = vpop.f32.mrf.mxu3 }
 0x28c   : > { %v1103_v46 = vadd.f32 %v809_v45, %v1841_v25 }
 0x28e   : > { %1111 = vst.msk [vmem:[%s2043_s28] sm:$0xff] %vm750_vm1, %v1103_v46 }
 0x293   : > { %v812_v44 = vpop.f32.mrf.mxu3 }
 0x294   : > { %v1104_v47 = vadd.f32 %v812_v44, %v1832_v21 }
 0x296   : > { %1112 = vst.msk [vmem:[%s2043_s28 + $0x8] sm:$0xff] %vm750_vm1, %v1104_v47 }
 0x298   : > { %v1062_v49 = vpop.f32.mrf.mxu1 }
 0x299   : > { %1346 = vmatmul.msk.f32.vlgmr.msrb.gmra.mxu2 %vm750_vm1, %v1062_v49 }
 0x29b   : > { %v870_v48 = vpop.f32.mrf.mxu3 }
 0x29c   : > { %1334 = vmatmul.msk.f32.vlgmr.msrb.gmra.mxu3 %vm750_vm1, %v870_v48 }
 0x29d   : > { %1357 = vmatpush.xpose.msk.msrb.mxu3 %vm750_vm1, %v710_v28 }
 0x2a0   : > { %v1065_v21 = vpop.f32.mrf.mxu1 }
 0x2a1   : > { %1358 = vmatpush.xpose.msk.msrb.mxu3 %vm750_vm1, %v707_v32  ;;  %1347 = vmatmul.msk.f32.gmra.mxu2 %vm750_vm1, %v1065_v21 }
 0x2a3   : > { %v873_v25 = vpop.f32.mrf.mxu3 }
 0x2a4   : > { %1335 = vmatmul.msk.f32.gmra.mxu3 %vm750_vm1, %v873_v25 }
 0x2ac   : > { %1336 = vmatmul.msk.f32.vlgmr.msra.gmra.mxu3 %vm750_vm1, %v927_v30 }
 0x2b4   : > { %1337 = vmatmul.msk.f32.gmra.mxu3 %vm750_vm1, %v928_v33 }
 0x31c   : > { %v1097_v56 = vpop.f32.mrf.mxu2 }
 0x31d   : > { %v1109_v57 = vadd.f32 %v1097_v56, %v1800_v5 }
 0x31f   : > { %v905_v50 = vpop.f32.mrf.mxu3  ;;  %1117 = vst.msk [vmem:[%s2043_s28 + $0x30] sm:$0xff] %vm750_vm1, %v1109_v57 }
 0x320   : > { %v1105_v51 = vadd.f32 %v905_v50, %v1826_v18 }
 0x322   : > { %1113 = vst.msk [vmem:[%s2043_s28 + $0x10] sm:$0xff] %vm750_vm1, %v1105_v51 }
 0x324   : > { %v1100_v18 = vpop.f32.mrf.mxu2 }
 0x325   : > { %v1110_v58 = vadd.f32 %v1100_v18, %v1791_v2 }
 0x327   : > { %v908_v52 = vpop.f32.mrf.mxu3  ;;  %1118 = vst.msk [vmem:[%s2043_s28 + $0x38] sm:$0xff] %vm750_vm1, %v1110_v58 }
 0x328   : > { %v1106_v53 = vadd.f32 %v908_v52, %v1820_v15 }
 0x32a   : > { %1114 = vst.msk [vmem:[%s2043_s28 + $0x18] sm:$0xff] %vm750_vm1, %v1106_v53 }
 0x32f   : > { %v966_v54 = vpop.f32.mrf.mxu3 }
 0x330   : > { %1340 = vmatmul.msk.f32.vlgmr.msrb.gmra.mxu0 %vm750_vm1, %v966_v54 }
 0x337   : > { %v969_v55 = vpop.f32.mrf.mxu3 }
 0x338   : > { %1341 = vmatmul.msk.f32.vlgmr.msrb.gmra.mxu3 %vm750_vm1, %v969_v55 }
 0x3ad   : > { %v1001_v15 = vpop.f32.mrf.mxu0 }
 0x3ae   : > { %v1107_v59 = vadd.f32 %v1001_v15, %v1811_v11 }
 0x3b0   : > { %1115 = vst.msk [vmem:[%s2043_s28 + $0x20] sm:$0xff] %vm750_vm1, %v1107_v59 }
 0x3bb   : > { %v1004_v5 = vpop.f32.mrf.mxu3 }
 0x3bc   : > { %v1108_v2 = vadd.f32 %v1004_v5, %v1805_v8 }
 0x3be   : > { %1116 = vst.msk [vmem:[%s2043_s28 + $0x28] sm:$0xff] %vm750_vm1, %v1108_v2 }
 0x3bf   : > { %1541 = shalt.err (!%p1538_p7)
}
 0x3c0   : > { %s1589_s2 = smov 128   ;;  %s1590_s8 = smov 8  }
 0x3c1   : > { %1365 = dma.vmem_to_hbm [thread:$0]  (%p1667_p11), %s1133_s10, 1024, %s1135_s24, %s1120_s15, %s1589_s2, %s1589_s2, %s1590_s8  }
 0x3c2 PF: > { %s1149_s6 = sand.u32 1, %s1572_s18   ;;  %p1378_p0 = pnand %p1253_p9, %p1671_p12 }
 0x3c3   : > { %s1150_s9 = scalar_lea.sflag [#allocation4], %s1149_s6 }
 0x3c4   : > { %p1379_p8 = pneg %p1378_p0 }
 0x3c6   : > { %1567 = dma.done.wait (%p1379_p8), %s1150_s9, 1024  }
 0x3c7   : > { %1569 = vsyncadd (%p1379_p8), %s1150_s9, 4294966272  ;;  %s2138_s21 = sld [smem:[#allocation13_spill]]  ;;  %s2141_s18 = smov %s1576_s19 }
 0x3c8   : > { %s2139_s17 = sld [smem:[#allocation12_spill]] }
 0x3c9   : > { %s2140_s20 = sld [smem:[#allocation14_spill]] }
 0x3cd   : > { %p21_p10 = scmp.ge.s32.totalorder %s2138_s21, 4  }
 0x3ce   : > { %s2142_s19 = smov %s2139_s17 }
 0x3cf   :  { %23 = sbr.rel (!%p21_p10) target bundleno = 10 (0xa), region = 113 }
 0x3d4   :  { %1156 = vsyncpa [#allocation3], 1 }
 0x3d5   :  { %1158 = vsyncpa [#allocation3 + $0x1], 1 }
 0x3d6   :  { %1159 = vsyncpa [#allocation6], 1 }
 0x3d7   :  { %1161 = vsyncpa [#allocation6 + $0x1], 1 }
 0x3d8   :  { %1162 = vsyncpa [#allocation4], 1 }
 0x3d9   :  { %1164 = vsyncpa [#allocation4 + $0x1], 1 }

</bundles_post_ra>
